<compile_context>
chip_gen: v7x
topology: tpu7x:2x2x1
jax: 0.10.0
libtpu: 0.0.40
codegen_flags: <defaults>
</compile_context>

<pallas_src>
import functools

import jax
import jax.numpy as jnp
from jax.experimental import pallas as pl
from jax.experimental.pallas import tpu as pltpu

QUANT_GRIDS = {
    "e1m2": (-1.75, -1.5, -1.25, -1.0, -0.75, -0.5, -0.25, 0.0,
             0.25, 0.5, 0.75, 1.0, 1.25, 1.5, 1.75),
    "e2m1": (-6.0, -4.0, -3.0, -2.0, -1.5, -1.0, -0.5, 0.0,
             0.5, 1.0, 1.5, 2.0, 3.0, 4.0, 6.0),
    "e3m0": (-16.0, -8.0, -4.0, -2.0, -1.0, -0.5, -0.25, 0.0,
             0.25, 0.5, 1.0, 2.0, 4.0, 8.0, 16.0),
}


def _absmax_kernel(x_ref, o_ref, *, block_rows, n_rows, inner):
    """Partial max(|x|): one (1,1) accumulator per outer ('parallel') index;
    the inner axis is the sequential reduction."""
    @pl.when(pl.program_id(1) == 0)
    def _():
        o_ref[...] = jnp.zeros_like(o_ref)

    a = jnp.abs(x_ref[...].astype(jnp.float32))
    if n_rows % block_rows != 0:
        # mask out-of-bounds rows of the (possibly partial) tail block
        gi = pl.program_id(0) * inner + pl.program_id(1)
        row = gi * block_rows + jax.lax.broadcasted_iota(jnp.int32, a.shape, 0)
        a = jnp.where(row < n_rows, a, 0.0)
    o_ref[...] = jnp.maximum(o_ref[...], jnp.max(a))


def _quant_kernel(sig_ref, pmax_ref, x_ref, o_ref, *,
                  g_min, midpoints, deltas, grid_absmax, n_part):
    """Clamp, per-row (group) scale, midpoint-threshold quantize, rescale."""
    # clip = sigmoid(logit) * global_absmax, fused here (no glue op between passes)
    gmax = pmax_ref[0, 0]
    for c in range(1, n_part):          # n_part <= 8, static unroll of scalar maxes
        gmax = jnp.maximum(gmax, pmax_ref[c, 0])
    clip = sig_ref[0, 0] * gmax

    x = x_ref[...].astype(jnp.float32)
    xc = jnp.minimum(jnp.maximum(x, -clip), clip)

    # per-group scale: group == last axis (128 lanes); divides are per-row only.
    # NOTE: an all-zero group gives scale == 0 (NaN in the PyTorch reference);
    # behavior for that degenerate case is not guarded here either.
    row_absmax = jnp.max(jnp.abs(xc), axis=-1, keepdims=True)
    scale = row_absmax / jnp.float32(grid_absmax)
    inv_scale = jnp.float32(1.0) / scale
    xs = xc * inv_scale

    # nearest grid value via monotone midpoint thresholds.  Strict '>' keeps
    # exact-midpoint ties at the lower grid value, replicating torch.argmin's
    # first-minimum tie-break.
    q = jnp.full_like(xs, jnp.float32(g_min))
    for m, d in zip(midpoints, deltas):
        q = q + jnp.where(xs > jnp.float32(m), jnp.float32(d), jnp.float32(0.0))

    # forward value of xs + (xq*scale - xs).detach() is xq * scale
    o_ref[...] = (q * scale).astype(o_ref.dtype)


def fp_quantizer_sigmoid_forward(x, clipping_strength_logit, *,
                                 fmt="e2m1", group_size=128, block_rows=1024):
    grid_vals = [float(v) for v in QUANT_GRIDS[fmt]]
    grid_absmax = max(abs(v) for v in grid_vals)
    midpoints = tuple((grid_vals[i] + grid_vals[i + 1]) * 0.5
                      for i in range(len(grid_vals) - 1))
    deltas = tuple(grid_vals[i + 1] - grid_vals[i]
                   for i in range(len(grid_vals) - 1))

    orig_shape = x.shape
    assert x.size % group_size == 0, "total elements must divide group_size"
    x2 = x.reshape(-1, group_size)
    n_rows = x2.shape[0]

    # row-tile size: large tiles amortize per-grid-step overhead; a
    # (1024, 128) f32 tile is 512 KiB, so double-buffered in+out stays far
    # under the 16 MiB (v5e) / 32 MiB (v6e, v7x) scoped-VMEM defaults.
    if n_rows <= block_rows:
        br = n_rows                      # full extent is always a legal block dim
    else:
        br = max((block_rows // 8) * 8, 8)
    n_blocks = (n_rows + br - 1) // br

    # split the abs-max reduction so the outer axis can run "parallel"
    # (sharded across TensorCores on v7x; harmless on single-TC v5e/v6e)
    n_part = 1
    for p in (8, 4, 2):
        if n_blocks % p == 0:
            n_part = p
            break
    inner = n_blocks // n_part

    # ---- pass 1: partial global abs-max reduction (Pallas) ----
    pmax = pl.pallas_call(
        functools.partial(_absmax_kernel,
                          block_rows=br, n_rows=n_rows, inner=inner),
        out_shape=jax.ShapeDtypeStruct((n_part, 1), jnp.float32),
        grid=(n_part, inner),
        in_specs=[pl.BlockSpec((br, group_size),
                               lambda c, i: (c * inner + i, 0))],
        out_specs=pl.BlockSpec((1, 1), lambda c, i: (c, 0)),
        compiler_params=pltpu.CompilerParams(
            dimension_semantics=("parallel", "arbitrary")),
    )(x2)

    # sigmoid(logit) depends only on the parameter (not on pass 1), so it can
    # be scheduled concurrently with pass 1; the product with the global max
    # happens inside pass 2.
    sig = jax.nn.sigmoid(
        jnp.asarray(clipping_strength_logit, jnp.float32)).reshape(1, 1)

    # ---- pass 2: clamp + per-group quantization (Pallas) ----
    out2 = pl.pallas_call(
        functools.partial(_quant_kernel,
                          g_min=grid_vals[0], midpoints=midpoints,
                          deltas=deltas, grid_absmax=grid_absmax,
                          n_part=n_part),
        out_shape=jax.ShapeDtypeStruct(x2.shape, x.dtype),
        grid=(n_blocks,),
        in_specs=[
            pl.BlockSpec(memory_space=pltpu.SMEM),                 # sigmoid(logit)
            pl.BlockSpec(memory_space=pltpu.SMEM),                 # abs-max partials
            pl.BlockSpec((br, group_size), lambda i: (i, 0)),      # x tile
        ],
        out_specs=pl.BlockSpec((br, group_size), lambda i: (i, 0)),
        compiler_params=pltpu.CompilerParams(
            dimension_semantics=("parallel",)),
    )(sig, pmax, x2)

    return out2.reshape(orig_shape)


def _reference_forward(x, logit, fmt="e2m1", group_size=128):
    """Pure-JAX reference mirroring the PyTorch module (forward value)."""
    grid = jnp.asarray(QUANT_GRIDS[fmt], jnp.float32)
    clip_value = jax.nn.sigmoid(jnp.asarray(logit, jnp.float32)) * jnp.max(jnp.abs(x))
    xc = jnp.clip(x, -clip_value, clip_value)
    shp = xc.shape
    xg = xc.reshape(-1, group_size)
    scale = jnp.max(jnp.abs(xg), axis=-1, keepdims=True) / jnp.max(jnp.abs(grid))
    xs = xg / scale
    idx = jnp.argmin(jnp.abs(xs[..., None] - grid), axis=-1)
    xq = grid[idx]
    return (xq * scale).reshape(shp)


if __name__ == "__main__":
    key = jax.random.PRNGKey(0)
    # NCHW input, 2*4*16*16 = 2048 elements -> 16 groups of 128
    x = jax.random.normal(key, (2, 4, 16, 16), dtype=jnp.float32)

    # deterministic parameter init, matching nn.Parameter(torch.tensor(1.0) * 5)
    clipping_strength_logit = jnp.float32(5.0)

    out = fp_quantizer_sigmoid_forward(x, clipping_strength_logit,
                                       fmt="e2m1", group_size=128)
    out = jax.block_until_ready(out)

    ref = _reference_forward(x, clipping_strength_logit, fmt="e2m1", group_size=128)
    assert out.shape == x.shape and out.dtype == x.dtype
    assert jnp.allclose(out, ref, atol=1e-5, rtol=1e-5), "mismatch vs reference"

    print("KERNEL_OK")
</pallas_src>

<mosaic_0001>
module attributes {stable_mosaic.version = 11 : i64} {
  func.func @_absmax_kernel(%arg0: i32, %arg1: i32, %arg2: memref<16x128xf32, #tpu.memory_space<vmem>>, %arg3: memref<1x1xf32, #tpu.memory_space<vmem>>) attributes {dimension_semantics = [#tpu.dimension_semantics<parallel>, #tpu.dimension_semantics<arbitrary>], iteration_bounds = array<i64: 1, 1>, scalar_prefetch = 0 : i64, scratch_operands = 0 : i64, tpu.core_type = #tpu.core_type<tc>, window_params = [{transform_indices = @transform_0, window_bounds = array<i64: 16, 128>}, {transform_indices = @transform_1, window_bounds = array<i64: 1, 1>}]} {
    %c0_i32 = arith.constant 0 : i32
    %0 = arith.cmpi eq, %arg1, %c0_i32 : i32
    %1 = arith.extui %0 : i1 to i32
    %c0_i32_0 = arith.constant 0 : i32
    %2 = arith.cmpi ne, %1, %c0_i32_0 : i32
    scf.if %2 {
      %cst_6 = arith.constant 0.000000e+00 : f32
      %13 = vector.broadcast %cst_6 : f32 to vector<1x1xf32>
      %c0_7 = arith.constant 0 : index
      %c0_8 = arith.constant 0 : index
      %14 = vector.load %arg3[%c0_7, %c0_8] : memref<1x1xf32, #tpu.memory_space<vmem>>, vector<1x1xf32>
      tpu.vector_store %arg3[%c0_7, %c0_8], %13 {strides = array<i32>} : memref<1x1xf32, #tpu.memory_space<vmem>>, vector<1x1xf32>,
    } else {
    }
    %c0 = arith.constant 0 : index
    %c0_1 = arith.constant 0 : index
    %3 = vector.load %arg2[%c0, %c0_1] : memref<16x128xf32, #tpu.memory_space<vmem>>, vector<16x128xf32>
    %4 = math.absf %3 : vector<16x128xf32>
    %c0_2 = arith.constant 0 : index
    %c0_3 = arith.constant 0 : index
    %5 = vector.load %arg3[%c0_2, %c0_3] : memref<1x1xf32, #tpu.memory_space<vmem>>, vector<1x1xf32>
    %6 = vector.shape_cast %4 : vector<16x128xf32> to vector<1x16x128xf32>
    %cst = arith.constant dense<0xFF800000> : vector<1xf32>
    %7 = vector.multi_reduction <maximumf>, %6, %cst [1, 2] : vector<1x16x128xf32> to vector<1xf32>
    %8 = vector.shape_cast %7 : vector<1xf32> to vector<1x1x1xf32>
    %9 = vector.extract %8[0, 0, 0] : f32 from vector<1x1x1xf32>
    %10 = vector.broadcast %9 : f32 to vector<1x1xf32>
    %11 = arith.maximumf %5, %10 : vector<1x1xf32>
    %c0_4 = arith.constant 0 : index
    %c0_5 = arith.constant 0 : index
    %12 = vector.load %arg3[%c0_4, %c0_5] : memref<1x1xf32, #tpu.memory_space<vmem>>, vector<1x1xf32>
    tpu.vector_store %arg3[%c0_4, %c0_5], %11 {strides = array<i32>} : memref<1x1xf32, #tpu.memory_space<vmem>>, vector<1x1xf32>,
    return
  }
  func.func @transform_0(%arg0: i32, %arg1: i32) -> (i32, i32) {
    %c1_i32 = arith.constant 1 : i32
    %0 = arith.muli %arg0, %c1_i32 : i32
    %1 = arith.addi %0, %arg1 : i32
    %c0_i32 = arith.constant 0 : i32
    %c0_i32_0 = arith.constant 0 : i32
    return %1, %c0_i32 : i32, i32
  }
  func.func @transform_1(%arg0: i32, %arg1: i32) -> (i32, i32) {
    %c0_i32 = arith.constant 0 : i32
    %c0_i32_0 = arith.constant 0 : i32
    return %arg0, %c0_i32 : i32, i32
  }
}

</mosaic_0001>

<bundles_post_ra>
// kernel: tpu_custom_call.1
= control target key start
LH: loop header
LB: loop body
LE: loop exit
PB: predicated region body
PF: predicated region fallthrough
CT: control target
= control target key end

     0   :  { %6 = vsyncpa [#allocation3], 0  ;;  %s165_s0 = inlined_call_operand.hbm [shape: f32[16,128], index: 0, kind: input, shape index: {}]   ;;  %s166_s1 = inlined_call_operand.hbm [shape: f32[1,1], index: 1, kind: output, shape index: {}]  }
   0x1   :  { %7 = vsyncpa [#allocation4], 0  ;;  %s124_s6 = smov [#allocation2]   ;;  %s76_s10 = scalar_lea.hbm %s165_s0, 256 }
   0x2   :  { %s17_s7 = sshll.u32 %s124_s6, 4  ;;  %p77_p0 = scmp.ne.s32.totalorder %s165_s0, %s76_s10  ;;  %s18_s7 = int_to_ptr.vmem [resolvable:$true] %s17_s7 }
   0x3   :  { %p80_p1 = scmp.lt.u32.totalorder %s76_s10, %s165_s0 }
   0x5   :  { %p82_p2 = pnand %p80_p1, %p77_p0 }
   0x7   :  { %85 = shalt.err (!%p82_p2)
}
   0x8   :  { %s86_s15 = scalar_lea.vmem %s18_s7, 256  ;;  %p91_p4 = scmp.lt.s32.totalorder %s18_s7, %s18_s7 }
   0x9   :  { %p87_p3 = scmp.ne.s32.totalorder %s18_s7, %s86_s15  ;;  %p92_p5 = scmp.lt.s32.totalorder %s86_s15, %s86_s15 }
   0xb   :  { %p93_p6 = por %p92_p5, %p91_p4 }
   0xd   :  { %p94_p7 = pnand %p93_p6, %p87_p3 }
   0xf   :  { %97 = shalt.err (!%p94_p7)
}
  0x10   :  { %s125_s16 = smov 128   ;;  %s126_s17 = smov 8  }
  0x11   :  { %23 = dma.hbm_to_vmem [thread:$0]  %s165_s0, 256, %s18_s7, [#allocation3], %s125_s16, %s125_s16, %s126_s17  }
  0x12   :  { %120 = dma.done.wait [#allocation3], 256  }
  0x13   :  { %121 = vsyncadd [#allocation3], 4294967040  ;;  %vm33_vm0 = vcmask 0   ;;  %v127_v0 = vmov 0.0   ;;  %v35_v1 = vld [vmem:[#allocation2] sm:$0xff]  ;;  %v36_v2 = vld [vmem:[#allocation2 + $0x8] sm:$0xff] }
  0x14   :  { %34 = vst.msk [vmem:[#allocation5] sm:$0x1] %vm33_vm0, %v127_v0  ;;  %v37_v3 = vand.u32 2147483647, %v35_v1  ;;  %v38_v4 = vand.u32 2147483647, %v36_v2 }
  0x15   :  { %s128_s0 = smov [#allocation5]  }
  0x16   :  { %v40_v5 = vmax.f32.f32 %v37_v3, %v38_v4  ;;  %s60_s20 = sshll.u32 %s128_s0, 4  ;;  %s61_s20 = int_to_ptr.vmem [resolvable:$true] %s60_s20 }
  0x17   :  { %s98_s22 = scalar_lea.vmem %s61_s20, 16  ;;  %s102_s23 = scalar_lea.vmem %s61_s20, 32 }
  0x18   :  { %41 = vmax.xlane.f32.xlu0 %v40_v5  ;;  %p99_p8 = scmp.ne.s32.totalorder %s61_s20, %s98_s22  ;;  %p103_p9 = scmp.lt.s32.totalorder %s61_s20, %s61_s20 }
  0x19   :  { %p104_p10 = scmp.lt.s32.totalorder %s102_s23, %s98_s22 }
  0x1b   :  { %v39_v13 = vld [vmem:[#allocation5] sm:$0x1]  ;;  %p105_p11 = por %p104_p10, %p103_p9 }
  0x1d   :  { %p106_p12 = pnand %p105_p11, %p99_p8 }
  0xa5   :  { %v42_v6 = vpop.xlane.xlu0 %41 }
  0xa6   :  { %v43_v7 = vrot.slane %v42_v6, 4 }
  0xa8   :  { %v44_v8 = vmax.f32 %v42_v6, %v43_v7 }
  0xaa   :  { %v45_v9 = vrot.slane %v44_v8, 2 }
  0xac   :  { %v46_v10 = vmax.f32 %v44_v8, %v45_v9 }
  0xae   :  { %v47_v11 = vrot.slane %v46_v10, 1 }
  0xb0   :  { %v48_v12 = vmax.f32 %v46_v10, %v47_v11 }
  0xb2   :  { %69 = vpush %v48_v12 }
  0xe3   :  { %s70_s21 = spop %69 }
  0xe4   :  { %v50_v14 = vstv %s70_s21 }
  0xe5   :  { %v51_v15 = vmax.f32 %v39_v13, %v50_v14 }
  0xe7   :  { %53 = vst.msk [vmem:[#allocation5] sm:$0x1] %vm33_vm0, %v51_v15 }
  0xe8   :  { %109 = shalt.err (!%p106_p12)
}
  0xe9   :  { %s110_s26 = scalar_lea.hbm %s166_s1, 16 }
  0xea   :  { %p111_p13 = scmp.ne.s32.totalorder %s166_s1, %s110_s26  ;;  %p114_p0 = scmp.lt.u32.totalorder %s110_s26, %s166_s1 }
  0xec   :  { %p116_p1 = pnand %p114_p0, %p111_p13 }
  0xee   :  { %119 = shalt.err (!%p116_p1)
}
  0xef   :  { %63 = dma.vmem_to_hbm [thread:$0]  %s61_s20, 16, %s166_s1, [#allocation4]  }
  0xf0   :  { %122 = dma.done.wait [#allocation4], 16  }
  0xf1   :  { %123 = vsyncadd [#allocation4], 4294967280 }
  0xf2   :  { %67 = vsyncpa [#allocation3], 1 }
  0xf3   :  { %68 = vsyncpa [#allocation4], 1 }

</bundles_post_ra>
